<compile_context>
chip_gen: v7x
topology: tpu7x:2x2x1
jax: 0.10.0
libtpu: 0.0.40
codegen_flags: <defaults>
</compile_context>

<pallas_src>
import functools

import jax
import jax.numpy as jnp
import numpy as np
from jax import lax
from jax.experimental import pallas as pl
from jax.experimental.pallas import tpu as pltpu

EPS = 1e-5       # PyTorch InstanceNorm2d default eps
LANE = 128


def _round_up(x, m):
    return (x + m - 1) // m * m


def _down_kernel(x_ref, w_ref, b_ref, o_ref, *, wo, eps):
    """One (image, cout-tile) per grid step.

    x_ref : (1, Ho*Wo, C4s)  space-to-depth'd input, flattened spatial
    w_ref : (4, C4s, Tco)    per-tap weights, taps = [(1,1),(1,0),(0,1),(0,0)]
    b_ref : (1, Tco)         bias (f32)
    o_ref : (1, Ho*Wo, Tco)  output block
    """
    n_sp = x_ref.shape[1]                 # Ho * Wo
    xf = x_ref[0]                         # (n_sp, C4s)

    # Cheap boundary masks from an (n_sp, 1) iota (broadcast across lanes).
    ridx = lax.broadcasted_iota(jnp.int32, (n_sp, 1), 0)
    if (wo & (wo - 1)) == 0:              # power-of-two fast path (trace time)
        col0 = (ridx & (wo - 1)) == 0     # output column j == 0
    else:
        col0 = (ridx % wo) == 0
    top = ridx < wo                       # output row i == 0

    zero = jnp.zeros((), xf.dtype)
    # "previous column"  : x[i, j-1]        (roll by 1, mask j==0)
    xs = jnp.where(col0, zero, pltpu.roll(xf, 1, 0))
    # "previous row"     : x[i-1, j]        (roll by wo, mask i==0)
    xu = jnp.where(top, zero, pltpu.roll(xf, wo, 0))
    # "previous row/col" : x[i-1, j-1]      (roll the already-masked xs by wo)
    xus = jnp.where(top, zero, pltpu.roll(xs, wo, 0))

    def mm(a, wt):
        return jnp.dot(a, wt, preferred_element_type=jnp.float32)

    # Single fused accumulation: 4 MXU matmuls + bias, one value, no RMW passes.
    y = (mm(xf, w_ref[0]) + mm(xs, w_ref[1])
         + mm(xu, w_ref[2]) + mm(xus, w_ref[3]) + b_ref[...])

    # Fused single-pass InstanceNorm (affine=False) + ReLU, f32 stats.
    inv_n = 1.0 / n_sp
    s1 = jnp.sum(y, axis=0, keepdims=True)
    s2 = jnp.sum(y * y, axis=0, keepdims=True)
    mean = s1 * inv_n
    var = jnp.maximum(s2 * inv_n - mean * mean, 0.0)
    o_ref[0] = jnp.maximum((y - mean) * lax.rsqrt(var + eps), 0.0)


def down_pallas(x_nchw, weight_oihw, bias, *, eps=EPS, use_bf16=None):
    """Conv2d(3x3, stride 2, pad 1, bias) + InstanceNorm2d + ReLU.

    x_nchw      : (N, Cin, H, W) float32, H and W even.
    weight_oihw : (Cout, Cin, 3, 3) float32 (PyTorch Conv2d layout).
    bias        : (Cout,) float32.
    Returns (N, Cout, H//2, W//2) float32.
    """
    N, cin, H, W = x_nchw.shape
    cout = weight_oihw.shape[0]
    if H % 2 or W % 2:
        raise ValueError("down_pallas assumes even H and W")
    ho, wo = H // 2, W // 2
    n_sp = ho * wo

    c4 = 4 * cin
    if use_bf16 is None:
        use_bf16 = c4 >= 128              # bf16 MXU operands for real channel counts
    sub = 16 if use_bf16 else 8
    c4s = _round_up(c4, sub)              # contraction dim: sublane-padded only
    # Output channels: lane-pad only when it costs <= 2x; tiny Cout stays native.
    cop = _round_up(cout, LANE) if cout >= 64 else _round_up(cout, 8)
    # Cout tiling: second parallel grid axis (megacore occupancy, smaller blocks).
    t_co = LANE if (cop % LANE == 0 and cop >= 2 * LANE) else cop
    n_co = cop // t_co

    # --- space-to-depth (stride-2 conv -> 4-tap stride-1 conv), done once in XLA.
    x = jnp.transpose(x_nchw, (0, 2, 3, 1))                    # NHWC
    x4 = x.reshape(N, ho, 2, wo, 2, cin)
    x4 = jnp.transpose(x4, (0, 1, 3, 2, 4, 5))                 # n, ho, wo, pr, pc, c
    x4 = x4.reshape(N, n_sp, c4)
    if c4s != c4:
        x4 = jnp.pad(x4, ((0, 0), (0, 0), (0, c4s - c4)))

    # --- rearrange 3x3 weights into the 4 phase taps.  For tap (Di, Dj) and
    #     phase (pr, pc): di = 2*Di + pr - 1, dj = 2*Dj + pc - 1 (offsets
    #     outside [0, 3) contribute zero).
    w_k = jnp.transpose(weight_oihw, (2, 3, 1, 0)).astype(jnp.float32)  # (di,dj,Cin,Cout)
    w4 = jnp.zeros((4, c4s, cop), jnp.float32)
    for t, (Di, Dj) in enumerate(((1, 1), (1, 0), (0, 1), (0, 0))):
        for pr in range(2):
            di = 2 * Di + pr - 1
            if not 0 <= di < 3:
                continue
            for pc in range(2):
                dj = 2 * Dj + pc - 1
                if not 0 <= dj < 3:
                    continue
                c0 = (pr * 2 + pc) * cin
                w4 = w4.at[t, c0:c0 + cin, :cout].set(w_k[di, dj])

    b2 = jnp.zeros((1, cop), jnp.float32).at[0, :cout].set(bias.astype(jnp.float32))

    if use_bf16:
        x4 = x4.astype(jnp.bfloat16)
        w4 = w4.astype(jnp.bfloat16)

    # --- VMEM budget from actual block sizes; cap leaves compiler headroom
    #     (v7x: 64 MiB physical per TC, v5e/v6e: 128 MiB).
    itm = 2 if use_bf16 else 4
    xb = n_sp * c4s * itm
    wb = 4 * c4s * t_co * itm
    bb = 8 * _round_up(t_co, LANE) * 4
    ob = n_sp * t_co * 4
    est = 2 * (xb + wb + bb + ob) + n_sp * t_co * 4 + (2 << 20)
    try:
        cap = int(getattr(pltpu.get_tpu_info(), "vmem_capacity_bytes", 64 << 20))
    except Exception:
        cap = 64 << 20
    ceiling = cap * 3 // 4
    vmem_limit = int(min(max(est, 32 << 20), ceiling))

    kernel = functools.partial(_down_kernel, wo=wo, eps=eps)

    out = pl.pallas_call(
        kernel,
        out_shape=jax.ShapeDtypeStruct((N, n_sp, cop), jnp.float32),
        grid_spec=pltpu.PrefetchScalarGridSpec(
            num_scalar_prefetch=0,
            grid=(N, n_co),
            in_specs=[
                pl.BlockSpec((1, n_sp, c4s), lambda n, c: (n, 0, 0)),
                # Constant-per-n index_map: weights/bias fetched once per cout
                # tile and kept resident across the parallel batch axis.
                pl.BlockSpec((4, c4s, t_co), lambda n, c: (0, 0, c)),
                pl.BlockSpec((1, t_co), lambda n, c: (0, c)),
            ],
            out_specs=pl.BlockSpec((1, n_sp, t_co), lambda n, c: (n, 0, c)),
        ),
        compiler_params=pltpu.CompilerParams(
            dimension_semantics=("parallel", "parallel"),
            vmem_limit_bytes=vmem_limit),
    )(x4, w4, b2)

    out = out.reshape(N, ho, wo, cop)
    if cop != cout:
        out = out[..., :cout]
    return jnp.transpose(out, (0, 3, 1, 2))                    # -> NCHW


def down_reference(x_nchw, weight_oihw, bias, eps=EPS):
    """Pure-JAX reference (XLA conv) with identical math."""
    y = lax.conv_general_dilated(
        x_nchw, weight_oihw, window_strides=(2, 2),
        padding=((1, 1), (1, 1)),
        dimension_numbers=("NCHW", "OIHW", "NCHW"),
        precision=lax.Precision.HIGHEST)
    y = y + bias.reshape(1, -1, 1, 1)
    m = jnp.mean(y, axis=(2, 3), keepdims=True)
    v = jnp.mean((y - m) ** 2, axis=(2, 3), keepdims=True)
    return jnp.maximum((y - m) / jnp.sqrt(v + eps), 0.0)


if __name__ == "__main__":
    N, Cin, Cout, H, W = 2, 4, 8, 16, 16
    key = jax.random.PRNGKey(0)
    kx, kw, kb = jax.random.split(key, 3)

    x = jax.random.normal(kx, (N, Cin, H, W), dtype=jnp.float32)
    scale = 1.0 / np.sqrt(Cin * 3 * 3)
    w = jax.random.normal(kw, (Cout, Cin, 3, 3), dtype=jnp.float32) * scale
    b = jax.random.normal(kb, (Cout,), dtype=jnp.float32) * scale

    out = jax.block_until_ready(down_pallas(x, w, b))
    ref = jax.block_until_ready(down_reference(x, w, b))
    np.testing.assert_allclose(np.asarray(out), np.asarray(ref),
                               rtol=2e-3, atol=2e-3)

    print("KERNEL_OK")
</pallas_src>

<mosaic_0001>
module attributes {stable_mosaic.version = 11 : i64} {
  func.func @_down_kernel(%arg0: i32, %arg1: i32, %arg2: memref<1x64x16xf32, #tpu.memory_space<vmem>>, %arg3: memref<4x16x8xf32, #tpu.memory_space<vmem>>, %arg4: memref<1x8xf32, #tpu.memory_space<vmem>>, %arg5: memref<1x64x8xf32, #tpu.memory_space<vmem>>) attributes {dimension_semantics = [#tpu.dimension_semantics<parallel>, #tpu.dimension_semantics<parallel>], iteration_bounds = array<i64: 2, 1>, scalar_prefetch = 0 : i64, scratch_operands = 0 : i64, tpu.core_type = #tpu.core_type<tc>, window_params = [{transform_indices = @transform_0, window_bounds = array<i64: 1, 64, 16>}, {transform_indices = @transform_1, window_bounds = array<i64: 4, 16, 8>}, {transform_indices = @transform_2, window_bounds = array<i64: 1, 8>}, {transform_indices = @transform_3, window_bounds = array<i64: 1, 64, 8>}]} {
    %c0 = arith.constant 0 : index
    %c0_0 = arith.constant 0 : index
    %c0_1 = arith.constant 0 : index
    %0 = vector.load %arg2[%c0, %c0_0, %c0_1] : memref<1x64x16xf32, #tpu.memory_space<vmem>>, vector<1x64x16xf32>
    %1 = vector.shape_cast %0 : vector<1x64x16xf32> to vector<64x16xf32>
    %2 = tpu.iota {dimensions = array<i32: 0>} : vector<64x1xi32>
    %c7_i32 = arith.constant 7 : i32
    %3 = vector.broadcast %c7_i32 : i32 to vector<64x1xi32>
    %4 = arith.andi %2, %3 : vector<64x1xi32>
    %c0_i32 = arith.constant 0 : i32
    %5 = vector.broadcast %c0_i32 : i32 to vector<64x1xi32>
    %6 = arith.cmpi eq, %4, %5 : vector<64x1xi32>
    %c8_i32 = arith.constant 8 : i32
    %7 = vector.broadcast %c8_i32 : i32 to vector<64x1xi32>
    %8 = arith.cmpi slt, %2, %7 : vector<64x1xi32>
    %c1_i32 = arith.constant 1 : i32
    %9 = tpu.dynamic_rotate %1 by %c1_i32 dim 0 : vector<64x16xf32>, i32 -> vector<64x16xf32>
    %cst = arith.constant 0.000000e+00 : f32
    %10 = vector.shape_cast %6 : vector<64x1xi1> to vector<64x1xi1>
    %11 = vector.broadcast %10 : vector<64x1xi1> to vector<64x16xi1>
    %12 = vector.broadcast %cst : f32 to vector<64x16xf32>
    %13 = arith.select %11, %12, %9 : vector<64x16xi1>, vector<64x16xf32>
    %c8_i32_2 = arith.constant 8 : i32
    %14 = tpu.dynamic_rotate %1 by %c8_i32_2 dim 0 : vector<64x16xf32>, i32 -> vector<64x16xf32>
    %cst_3 = arith.constant 0.000000e+00 : f32
    %15 = vector.shape_cast %8 : vector<64x1xi1> to vector<64x1xi1>
    %16 = vector.broadcast %15 : vector<64x1xi1> to vector<64x16xi1>
    %17 = vector.broadcast %cst_3 : f32 to vector<64x16xf32>
    %18 = arith.select %16, %17, %14 : vector<64x16xi1>, vector<64x16xf32>
    %c8_i32_4 = arith.constant 8 : i32
    %19 = tpu.dynamic_rotate %13 by %c8_i32_4 dim 0 : vector<64x16xf32>, i32 -> vector<64x16xf32>
    %cst_5 = arith.constant 0.000000e+00 : f32
    %20 = vector.shape_cast %8 : vector<64x1xi1> to vector<64x1xi1>
    %21 = vector.broadcast %20 : vector<64x1xi1> to vector<64x16xi1>
    %22 = vector.broadcast %cst_5 : f32 to vector<64x16xf32>
    %23 = arith.select %21, %22, %19 : vector<64x16xi1>, vector<64x16xf32>
    %c0_6 = arith.constant 0 : index
    %c0_7 = arith.constant 0 : index
    %c0_8 = arith.constant 0 : index
    %24 = vector.load %arg3[%c0_6, %c0_7, %c0_8] : memref<4x16x8xf32, #tpu.memory_space<vmem>>, vector<1x16x8xf32>
    %25 = vector.shape_cast %24 : vector<1x16x8xf32> to vector<16x8xf32>
    %cst_9 = arith.constant dense<0.000000e+00> : vector<64x8xf32>
    %26 = tpu.matmul %1, %25, %cst_9 {dimension_numbers = #tpu.dot_dimension_numbers<[1], [0], [0], [1], [0, 0, 1, 1], [], []>} : vector<64x16xf32>, vector<16x8xf32>, vector<64x8xf32> -> vector<64x8xf32>
    %c1 = arith.constant 1 : index
    %c0_10 = arith.constant 0 : index
    %c0_11 = arith.constant 0 : index
    %27 = vector.load %arg3[%c1, %c0_10, %c0_11] : memref<4x16x8xf32, #tpu.memory_space<vmem>>, vector<1x16x8xf32>
    %28 = vector.shape_cast %27 : vector<1x16x8xf32> to vector<16x8xf32>
    %cst_12 = arith.constant dense<0.000000e+00> : vector<64x8xf32>
    %29 = tpu.matmul %13, %28, %cst_12 {dimension_numbers = #tpu.dot_dimension_numbers<[1], [0], [0], [1], [0, 0, 1, 1], [], []>} : vector<64x16xf32>, vector<16x8xf32>, vector<64x8xf32> -> vector<64x8xf32>
    %30 = arith.addf %26, %29 : vector<64x8xf32>
    %c2 = arith.constant 2 : index
    %c0_13 = arith.constant 0 : index
    %c0_14 = arith.constant 0 : index
    %31 = vector.load %arg3[%c2, %c0_13, %c0_14] : memref<4x16x8xf32, #tpu.memory_space<vmem>>, vector<1x16x8xf32>
    %32 = vector.shape_cast %31 : vector<1x16x8xf32> to vector<16x8xf32>
    %cst_15 = arith.constant dense<0.000000e+00> : vector<64x8xf32>
    %33 = tpu.matmul %18, %32, %cst_15 {dimension_numbers = #tpu.dot_dimension_numbers<[1], [0], [0], [1], [0, 0, 1, 1], [], []>} : vector<64x16xf32>, vector<16x8xf32>, vector<64x8xf32> -> vector<64x8xf32>
    %34 = arith.addf %30, %33 : vector<64x8xf32>
    %c3 = arith.constant 3 : index
    %c0_16 = arith.constant 0 : index
    %c0_17 = arith.constant 0 : index
    %35 = vector.load %arg3[%c3, %c0_16, %c0_17] : memref<4x16x8xf32, #tpu.memory_space<vmem>>, vector<1x16x8xf32>
    %36 = vector.shape_cast %35 : vector<1x16x8xf32> to vector<16x8xf32>
    %cst_18 = arith.constant dense<0.000000e+00> : vector<64x8xf32>
    %37 = tpu.matmul %23, %36, %cst_18 {dimension_numbers = #tpu.dot_dimension_numbers<[1], [0], [0], [1], [0, 0, 1, 1], [], []>} : vector<64x16xf32>, vector<16x8xf32>, vector<64x8xf32> -> vector<64x8xf32>
    %38 = arith.addf %34, %37 : vector<64x8xf32>
    %c0_19 = arith.constant 0 : index
    %c0_20 = arith.constant 0 : index
    %39 = vector.load %arg4[%c0_19, %c0_20] : memref<1x8xf32, #tpu.memory_space<vmem>>, vector<1x8xf32>
    %40 = vector.broadcast %39 : vector<1x8xf32> to vector<64x8xf32>
    %41 = arith.addf %38, %40 : vector<64x8xf32>
    %cst_21 = arith.constant dense<0.000000e+00> : vector<8xf32>
    %42 = vector.multi_reduction <add>, %41, %cst_21 [0] : vector<64x8xf32> to vector<8xf32>
    %43 = vector.shape_cast %42 : vector<8xf32> to vector<1x8xf32>
    %44 = arith.mulf %41, %41 : vector<64x8xf32>
    %cst_22 = arith.constant dense<0.000000e+00> : vector<8xf32>
    %45 = vector.multi_reduction <add>, %44, %cst_22 [0] : vector<64x8xf32> to vector<8xf32>
    %46 = vector.shape_cast %45 : vector<8xf32> to vector<1x8xf32>
    %cst_23 = arith.constant 1.562500e-02 : f32
    %47 = vector.broadcast %cst_23 : f32 to vector<1x8xf32>
    %48 = arith.mulf %43, %47 : vector<1x8xf32>
    %cst_24 = arith.constant 1.562500e-02 : f32
    %49 = vector.broadcast %cst_24 : f32 to vector<1x8xf32>
    %50 = arith.mulf %46, %49 : vector<1x8xf32>
    %51 = arith.mulf %48, %48 : vector<1x8xf32>
    %52 = arith.subf %50, %51 : vector<1x8xf32>
    %cst_25 = arith.constant 0.000000e+00 : f32
    %53 = vector.broadcast %cst_25 : f32 to vector<1x8xf32>
    %54 = arith.maximumf %52, %53 : vector<1x8xf32>
    %55 = vector.broadcast %48 : vector<1x8xf32> to vector<64x8xf32>
    %56 = arith.subf %41, %55 : vector<64x8xf32>
    %cst_26 = arith.constant 9.99999974E-6 : f32
    %57 = vector.broadcast %cst_26 : f32 to vector<1x8xf32>
    %58 = arith.addf %54, %57 : vector<1x8xf32>
    %59 = math.rsqrt %58 : vector<1x8xf32>
    %60 = vector.broadcast %59 : vector<1x8xf32> to vector<64x8xf32>
    %61 = arith.mulf %56, %60 : vector<64x8xf32>
    %cst_27 = arith.constant 0.000000e+00 : f32
    %62 = vector.broadcast %cst_27 : f32 to vector<64x8xf32>
    %63 = arith.maximumf %61, %62 : vector<64x8xf32>
    %c0_28 = arith.constant 0 : index
    %c0_29 = arith.constant 0 : index
    %c0_30 = arith.constant 0 : index
    %64 = vector.load %arg5[%c0_28, %c0_29, %c0_30] : memref<1x64x8xf32, #tpu.memory_space<vmem>>, vector<1x64x8xf32>
    %65 = vector.shape_cast %64 : vector<1x64x8xf32> to vector<64x8xf32>
    %66 = vector.shape_cast %63 : vector<64x8xf32> to vector<1x64x8xf32>
    tpu.vector_store %arg5[%c0_28, %c0_29, %c0_30], %66 {strides = array<i32>} : memref<1x64x8xf32, #tpu.memory_space<vmem>>, vector<1x64x8xf32>,
    return
  }
  func.func @transform_0(%arg0: i32, %arg1: i32) -> (i32, i32, i32) {
    %c0_i32 = arith.constant 0 : i32
    %c0_i32_0 = arith.constant 0 : i32
    %c0_i32_1 = arith.constant 0 : i32
    return %arg0, %c0_i32, %c0_i32_0 : i32, i32, i32
  }
  func.func @transform_1(%arg0: i32, %arg1: i32) -> (i32, i32, i32) {
    %c0_i32 = arith.constant 0 : i32
    %c0_i32_0 = arith.constant 0 : i32
    %c0_i32_1 = arith.constant 0 : i32
    return %c0_i32, %c0_i32_0, %arg1 : i32, i32, i32
  }
  func.func @transform_2(%arg0: i32, %arg1: i32) -> (i32, i32) {
    %c0_i32 = arith.constant 0 : i32
    %c0_i32_0 = arith.constant 0 : i32
    return %c0_i32, %arg1 : i32, i32
  }
  func.func @transform_3(%arg0: i32, %arg1: i32) -> (i32, i32, i32) {
    %c0_i32 = arith.constant 0 : i32
    %c0_i32_0 = arith.constant 0 : i32
    return %arg0, %c0_i32, %arg1 : i32, i32, i32
  }
}

</mosaic_0001>

<bundles_post_ra>
// kernel: tpu_custom_call.1
= control target key start
LH: loop header
LB: loop body
LE: loop exit
PB: predicated region body
PF: predicated region fallthrough
CT: control target
= control target key end

     0   :  { %s1358_s12 = smov 0   ;;  %s1360_s13 = smov 0   ;;  %s1584_s0 = inlined_call_operand.vmem [shape: f32[2,64,16], index: 0, kind: input, shape index: {}]   ;;  %s1585_s1 = inlined_call_operand.vmem [shape: f32[4,16,8], index: 1, kind: input, shape index: {}]   ;;  %s1586_s2 = inlined_call_operand.vmem [shape: f32[1,8], index: 2, kind: input, shape index: {}]   ;;  %s1587_s3 = inlined_call_operand.vmem [shape: f32[2,64,8], index: 3, kind: output, shape index: {}]  }
   0x1   :  { %s1362_s14 = smov 0  }
   0x2 LB: > { %s25_s15 = sadd.s32 1, %s1331_s13  ;;  %p1096_p0 = scmp.ge.s32.totalorder %s1335_s14, 1  ;;  %s1335_s14 = sphi %s1362_s14, %s13_s14   ;;  %s1331_s13 = sphi %s1360_s13, %s1591_s13   ;;  %s1327_s12 = sphi %s1358_s12, %s1590_s12  }
   0x3   : > { %p27_p1 = scmp.ge.s32.totalorder %s25_s15, 2  ;;  %p168_p2 = scmp.lt.s32.totalorder %s1335_s14, 3 }
   0x5   : > { %s1593_s15 = smov (%p27_p1, %s25_s15), 0  ;;  %p169_p3 = pnand %p1096_p0, %p168_p2 }
   0x6   : > { %v1119_v0 = vld [vmem:[%s1585_s1 + $0x20] sm:$0xff] (!%p169_p3)  ;;  %v1120_v1 = vld [vmem:[%s1585_s1 + $0x28] sm:$0xff] (!%p169_p3)  ;;  %v1101_v2 = vld [vmem:[%s1585_s1 + $0x10] sm:$0xff] (!%p169_p3)  ;;  %p202_p4 = scmp.lt.s32.totalorder (!%p169_p3), %s1327_s12, 1  ;;  %v230_v3 = vlaneseq (!%p169_p3)  ;;  %v1337_v5 = vmov (!%p169_p3), 0.0   ;;  %vm341_vm0 = vcmask (!%p169_p3), 130048  }
   0x7   : > { %172 = sbr.rel (%p169_p3) target bundleno = 314 (0x13a), region = 32  ;;  %v1254_v4 = vpack.c.bf16 (!%p169_p3), %v1120_v1, %v1119_v0  ;;  %1218 = vmatprep.mubr.f32.mxu0 (!%p169_p3), %v1337_v5  ;;  %v1102_v6 = vld [vmem:[%s1585_s1 + $0x18] sm:$0xff] (!%p169_p3)  ;;  %v336_v7 = vld [vmem:[%s1585_s1] sm:$0xff] (!%p169_p3)  ;;  %v337_v8 = vld [vmem:[%s1585_s1 + $0x8] sm:$0xff] (!%p169_p3)  ;;  %vm895_vm10 = vcmask (!%p169_p3), 64512  }
   0x8   : > { %v1246_v9 = vpack.c.bf16 (!%p169_p3), %v1102_v6, %v1101_v2  ;;  %v1397_v10 = vshrl.u32 (!%p169_p3), %v230_v3, 7  ;;  %v1250_v11 = vpack.c.bf16 (!%p169_p3), %v337_v8, %v336_v7  ;;  %v1128_v12 = vld [vmem:[%s1585_s1 + $0x30] sm:$0xff] (!%p169_p3)  ;;  %v1129_v13 = vld [vmem:[%s1585_s1 + $0x38] sm:$0xff] (!%p169_p3)  ;;  %v1137_v3 = vld [vmem:[%s1586_s2] ss:$0 sm:$0xff] (!%p169_p3) }
   0x9   : > { %1255 = vmatprep.subr.bf16.mxu0 (!%p169_p3), %v1254_v4  ;;  %v1258_v14 = vpack.c.bf16 (!%p169_p3), %v1129_v13, %v1128_v12 }
   0xa   : > { %1257 = vmatpush3.bf16.msra.mxu0 (!%p169_p3), %v1254_v4  ;;  %1247 = vmatprep.subr.bf16.mxu1 (!%p169_p3), %v1246_v9  ;;  %v239_v15 = vand.u32 (!%p169_p3), 7, %v1397_v10  ;;  %vm271_vm1 = vcmp.lt.s32.totalorder (!%p169_p3), %v1397_v10, 1  ;;  %v232_v16 = vadd.s32 (!%p169_p3), 8, %v1397_v10  ;;  %v233_v17 = vadd.s32 (!%p169_p3), 16, %v1397_v10 }
   0xb   : > { %1249 = vmatpush3.bf16.msra.mxu1 (!%p169_p3), %v1246_v9  ;;  %1259 = vmatprep.subr.bf16.mxu0 (!%p169_p3), %v1258_v14  ;;  %v234_v18 = vadd.s32 (!%p169_p3), 24, %v1397_v10  ;;  %v235_v19 = vadd.s32 (!%p169_p3), 32, %v1397_v10  ;;  %v236_v20 = vadd.s32 (!%p169_p3), 40, %v1397_v10  ;;  %v237_v21 = vadd.s32 (!%p169_p3), 48, %v1397_v10 }
   0xc   : > { %vm1430_vm2 = vcmp.eq.s32.totalorder (!%p169_p3), %v239_v15, 0  ;;  %1251 = vmatprep.subr.bf16.mxu1 (!%p169_p3), %v1250_v11  ;;  %v240_v26 = vand.u32 (!%p169_p3), 7, %v232_v16  ;;  %v241_v27 = vand.u32 (!%p169_p3), 7, %v233_v17  ;;  %v238_v54 = vadd.s32 (!%p169_p3), 56, %v1397_v10 }
   0xd   : > { %v242_v40 = vand.u32 (!%p169_p3), 7, %v234_v18  ;;  %v243_v48 = vand.u32 (!%p169_p3), 7, %v235_v19  ;;  %v244_v51 = vand.u32 (!%p169_p3), 7, %v236_v20  ;;  %v245_v53 = vand.u32 (!%p169_p3), 7, %v237_v21 }
   0xe   : > { %s1595_s12 = smov (!%p202_p4, %s1327_s12), 1  ;;  %vm248_vm3 = vcmp.eq.s32.totalorder %v240_v26, 0  ;;  %vm249_vm4 = vcmp.eq.s32.totalorder %v241_v27, 0  ;;  %v246_v58 = vand.u32 7, %v238_v54 }
   0xf   : > { %s1140_s5 = sshll.u32 %s1595_s12, 6  ;;  %vm250_vm5 = vcmp.eq.s32.totalorder %v242_v40, 0  ;;  %vm251_vm6 = vcmp.eq.s32.totalorder %v243_v48, 0  ;;  %vm252_vm7 = vcmp.eq.s32.totalorder %v244_v51, 0  ;;  %vm253_vm8 = vcmp.eq.s32.totalorder %v245_v53, 0 }
  0x10   : > { %s1415_s8 = scalar_lea.vmem %s1584_s0, %s1140_s5  ;;  %vm254_vm9 = vcmp.eq.s32.totalorder %v246_v58, 0  ;;  %s221_s17 = scalar_lea.vmem %s1587_s3, %s1140_s5 }
  0x11   : > { %v1422_v22 = vld [vmem:[%s1415_s8] sm:$0xff]  ;;  %v1425_v23 = vld [vmem:[%s1415_s8 + $0x8] sm:$0xff]  ;;  %v1428_v24 = vld [vmem:[%s1415_s8 + $0x38] sm:$0xff] }
  0x12   : > { %v263_v28 = vrot.slane %v1422_v22, 7  ;;  %1219 = vmatmul.mubr.msk.f32.vlgmr.msra.gmra.mrb[0].mxu0 %vm341_vm0, %v1422_v22  ;;  %v264_v29 = vrot.slane %v1425_v23, 7  ;;  %v270_v30 = vrot.slane %v1428_v24, 7  ;;  %v224_v31 = vld [vmem:[%s1415_s8 + $0x10] sm:$0xff]  ;;  %v1441_v32 = vld [vmem:[%s1415_s8 + $0x18] sm:$0xff]  ;;  %v1444_v33 = vld [vmem:[%s1415_s8 + $0x20] sm:$0xff] }
  0x13   : > { %1221 = vmatprep.mubr.msk.f32.mxu0 %vm341_vm0, %v1425_v23  ;;  %v265_v34 = vrot.slane %v224_v31, 7  ;;  %1261 = vmatpush3.bf16.msra.mxu0 %v1258_v14  ;;  %v266_v35 = vrot.slane %v1441_v32, 7  ;;  %v227_v36 = vld [vmem:[%s1415_s8 + $0x28] sm:$0xff]  ;;  %v267_v39 = vrot.slane %v1444_v33, 7  ;;  %v228_v41 = vld [vmem:[%s1415_s8 + $0x30] sm:$0xff] }
  0x14   : > { %v279_v37 = vsel %vm271_vm1, %v270_v30, %v263_v28  ;;  %v278_v38 = vsel %vm271_vm1, %v263_v28, %v264_v29  ;;  %v268_v47 = vrot.slane %v227_v36, 7  ;;  %v269_v50 = vrot.slane %v228_v41, 7 }
  0x15   : > { %v296_v42 = vsel %vm1430_vm2, 0.0, %v279_v37  ;;  %v297_v43 = vsel %vm248_vm3, 0.0, %v278_v38  ;;  %v277_v44 = vsel %vm271_vm1, %v264_v29, %v265_v34  ;;  %v276_v45 = vsel %vm271_vm1, %v265_v34, %v266_v35 }
  0x16   : > { %1186 = vmatprep.mubr.msk.f32.mxu1 %vm341_vm0, %v296_v42  ;;  %1222 = vmatmul.mubr.msk.f32.gmra.mrb[2].mxu0 %vm341_vm0, %v224_v31  ;;  %v298_v46 = vsel %vm249_vm4, 0.0, %v277_v44  ;;  %v275_v49 = vsel %vm271_vm1, %v266_v35, %v267_v39  ;;  %v299_v52 = vsel %vm250_vm5, 0.0, %v276_v45  ;;  %v274_v56 = vsel %vm271_vm1, %v267_v39, %v268_v47 }
  0x17   : > { %1187 = vmatmul.mubr.msk.f32.vlgmr.msra.gmra.mrb[0].mxu1 %vm341_vm0, %v297_v43  ;;  %1224 = vmatprep.mubr.msk.f32.mxu0 %vm341_vm0, %v1441_v32  ;;  %v300_v55 = vsel %vm251_vm6, 0.0, %v275_v49  ;;  %v273_v57 = vsel %vm271_vm1, %v268_v47, %v269_v50  ;;  %v301_v59 = vsel %vm252_vm7, 0.0, %v274_v56  ;;  %v272_v61 = vsel %vm271_vm1, %v269_v50, %v270_v30 }
  0x18   : > { %1253 = vmatpush3.bf16.msra.mxu1 %v1250_v11  ;;  %1189 = vmatprep.mubr.msk.f32.mxu1 %vm341_vm0, %v298_v46  ;;  %v302_v60 = vsel %vm253_vm8, 0.0, %v273_v57  ;;  %v303_v62 = vsel %vm254_vm9, 0.0, %v272_v61 }
  0x1a   : > { %1225 = vmatmul.mubr.msk.f32.gmra.mrb[4].mxu0 %vm341_vm0, %v1444_v33 }
  0x1b   : > { %1190 = vmatmul.mubr.msk.f32.gmra.mrb[2].mxu1 %vm341_vm0, %v299_v52  ;;  %1227 = vmatprep.mubr.msk.f32.mxu0 %vm341_vm0, %v227_v36 }
  0x1c   : > { %1192 = vmatprep.mubr.msk.f32.mxu1 %vm341_vm0, %v300_v55 }
  0x1e   : > { %1228 = vmatmul.mubr.msk.f32.gmra.mrb[6].mxu0 %vm341_vm0, %v228_v41 }
  0x1f   : > { %1193 = vmatmul.mubr.msk.f32.gmra.mrb[4].mxu1 %vm341_vm0, %v301_v59  ;;  %1234 = vmatprep.mubr.f32.mxu0 %v1337_v5 }
  0x20   : > { %1195 = vmatprep.mubr.msk.f32.mxu1 %vm341_vm0, %v302_v60 }
  0x22   : > { %1235 = vmatmul.mubr.msk.f32.vlgmr.msra.gmra.mrb[0].mxu0 %vm341_vm0, %v296_v42 }
  0x23   : > { %1196 = vmatmul.mubr.msk.f32.gmra.mrb[6].mxu1 %vm341_vm0, %v303_v62  ;;  %1237 = vmatprep.mubr.msk.f32.mxu0 %vm341_vm0, %v297_v43 }
  0x24   : > { %1202 = vmatprep.mubr.msk.f32.mxu1 %vm341_vm0, %v1422_v22 }
  0x26   : > { %1238 = vmatmul.mubr.msk.f32.gmra.mrb[2].mxu0 %vm341_vm0, %v298_v46 }
  0x27   : > { %1203 = vmatmul.mubr.msk.f32.vlgmr.msra.gmra.mrb[0].mxu1 %vm341_vm0, %v1425_v23  ;;  %1240 = vmatprep.mubr.msk.f32.mxu0 %vm341_vm0, %v299_v52 }
  0x28   : > { %1205 = vmatprep.mubr.msk.f32.mxu1 %vm341_vm0, %v224_v31 }
  0x2a   : > { %1241 = vmatmul.mubr.msk.f32.gmra.mrb[4].mxu0 %vm341_vm0, %v300_v55 }
  0x2b   : > { %1206 = vmatmul.mubr.msk.f32.gmra.mrb[2].mxu1 %vm341_vm0, %v1441_v32  ;;  %1243 = vmatprep.mubr.msk.f32.mxu0 %vm341_vm0, %v301_v59 }
  0x2c   : > { %1208 = vmatprep.mubr.msk.f32.mxu1 %vm341_vm0, %v1444_v33 }
  0x2e   : > { %1244 = vmatmul.mubr.msk.f32.gmra.mrb[6].mxu0 %vm341_vm0, %v302_v60 }
  0x2f   : > { %1209 = vmatmul.mubr.msk.f32.gmra.mrb[4].mxu1 %vm341_vm0, %v227_v36 }
  0x30   : > { %1211 = vmatprep.mubr.msk.f32.mxu1 %vm341_vm0, %v228_v41 }
  0x33   : > { %1212 = vmatmul.mubr.msk.f32.gmra.mrb[6].mxu1 %vm341_vm0, %v1428_v24 }
  0xf5   : > { %v1236_v63 = vpop.f32.mrb[0].mxu0 }
  0xf6   : > { %v833_v0 = vpop.f32.mrb[1].mxu0 }
  0xf9   : > { %v1239_v1 = vpop.f32.mrb[2].mxu0 }
  0xfa   : > { %v1204_v2 = vpop.f32.mrb[0].mxu1  ;;  %v843_v4 = vpop.f32.mrb[3].mxu0 }
  0xfb   : > { %v1262_v5 = vadd.f32 %v1236_v63, %v1204_v2  ;;  %v561_v6 = vpop.f32.mrb[1].mxu1 }
  0xfc   : > { %v1263_v7 = vadd.f32 %v833_v0, %v561_v6 }
  0xfd   : > { %v1510_v8 = vadd.f32 %v1262_v5, %v1137_v3  ;;  %v1242_v9 = vpop.f32.mrb[4].mxu0 }
  0xfe   : > { %v1512_v10 = vadd.f32 %v1263_v7, %v1137_v3  ;;  %v1207_v11 = vpop.f32.mrb[2].mxu1  ;;  %v853_v12 = vpop.f32.mrb[5].mxu0 }
  0xff   : > { %v897_v13 = vsel %vm895_vm10, %v1510_v8, 0.0  ;;  %v918_v14 = vmul.f32 %v1510_v8, %v1510_v8  ;;  %v1264_v15 = vadd.f32 %v1239_v1, %v1207_v11  ;;  %v571_v16 = vpop.f32.mrb[3].mxu1 }
 0x100   : > { %v896_v17 = vsel %vm895_vm10, %v1512_v10, 0.0  ;;  %v917_v18 = vmul.f32 %v1512_v10, %v1512_v10  ;;  %v1265_v19 = vadd.f32 %v843_v4, %v571_v16 }
 0x101   : > { %v926_v20 = vsel %vm895_vm10, %v918_v14, 0.0  ;;  %v898_v21 = vadd.f32 %v897_v13, %v896_v17  ;;  %v1523_v22 = vadd.f32 %v1264_v15, %v1137_v3  ;;  %v1245_v23 = vpop.f32.mrb[6].mxu0 }
 0x102   : > { %v925_v24 = vsel %vm895_vm10, %v917_v18, 0.0  ;;  %v1526_v25 = vadd.f32 %v1265_v19, %v1137_v3  ;;  %v1210_v26 = vpop.f32.mrb[4].mxu1  ;;  %v863_v27 = vpop.f32.mrb[7].mxu0 }
 0x103   : > { %v927_v28 = vadd.f32 %v926_v20, %v925_v24  ;;  %v920_v29 = vmul.f32 %v1523_v22, %v1523_v22  ;;  %v1266_v30 = vadd.f32 %v1242_v9, %v1210_v26  ;;  %v581_v31 = vpop.f32.mrb[5].mxu1  ;;  %v901_v37 = vsel %vm895_vm10, %v1523_v22, 0.0 }
 0x104   : > { %v899_v32 = vsel %vm895_vm10, %v1526_v25, 0.0  ;;  %v919_v33 = vmul.f32 %v1526_v25, %v1526_v25  ;;  %v1267_v34 = vadd.f32 %v853_v12, %v581_v31 }
 0x105   : > { %v900_v35 = vadd.f32 %v899_v32, %v898_v21  ;;  %v1534_v36 = vadd.f32 %v1266_v30, %v1137_v3  ;;  %v930_v41 = vsel %vm895_vm10, %v920_v29, 0.0 }
 0x106   : > { %v928_v38 = vsel %vm895_vm10, %v919_v33, 0.0  ;;  %v1539_v39 = vadd.f32 %v1267_v34, %v1137_v3  ;;  %v1213_v40 = vpop.f32.mrb[6].mxu1 }
 0x107   : > { %v929_v42 = vadd.f32 %v928_v38, %v927_v28  ;;  %v922_v43 = vmul.f32 %v1534_v36, %v1534_v36  ;;  %v902_v44 = vadd.f32 %v901_v37, %v900_v35  ;;  %v591_v45 = vpop.f32.mrb[7].mxu1  ;;  %v1268_v48 = vadd.f32 %v1245_v23, %v1213_v40 }
 0x108   : > { %v903_v46 = vsel %vm895_vm10, %v1539_v39, 0.0  ;;  %v921_v47 = vmul.f32 %v1539_v39, %v1539_v39  ;;  %v1269_v49 = vadd.f32 %v863_v27, %v591_v45  ;;  %v905_v52 = vsel %vm895_vm10, %v1534_v36, 0.0 }
 0x109   : > { %v904_v50 = vadd.f32 %v903_v46, %v902_v44  ;;  %v931_v51 = vadd.f32 %v930_v41, %v929_v42  ;;  %v894_v54 = vadd.f32 %v1268_v48, %v1137_v3  ;;  %v934_v58 = vsel %vm895_vm10, %v922_v43, 0.0 }
 0x10a   : > { %v932_v53 = vsel %vm895_vm10, %v921_v47, 0.0  ;;  %v893_v55 = vadd.f32 %v1269_v49, %v1137_v3 }
 0x10b   : > { %v933_v56 = vadd.f32 %v932_v53, %v931_v51  ;;  %v906_v57 = vadd.f32 %v905_v52, %v904_v50  ;;  %v924_v59 = vmul.f32 %v894_v54, %v894_v54  ;;  %v909_v0 = vsel %vm895_vm10, %v894_v54, 0.0 }
 0x10c   : > { %v907_v60 = vsel %vm895_vm10, %v893_v55, 0.0  ;;  %v923_v61 = vmul.f32 %v893_v55, %v893_v55 }
 0x10d   : > { %v908_v62 = vadd.f32 %v907_v60, %v906_v57  ;;  %v935_v63 = vadd.f32 %v934_v58, %v933_v56  ;;  %v938_v5 = vsel %vm895_vm10, %v924_v59, 0.0 }
 0x10e   : > { %v936_v1 = vsel %vm895_vm10, %v923_v61, 0.0 }
 0x10f   : > { %v910_v2 = vadd.f32 %v909_v0, %v908_v62  ;;  %v937_v4 = vadd.f32 %v936_v1, %v935_v63 }
 0x111   : > { %v911_v6 = vrot.slane %v910_v2, 4  ;;  %v939_v3 = vadd.f32 %v938_v5, %v937_v4 }
 0x113   : > { %v912_v7 = vadd.f32 %v911_v6, %v910_v2  ;;  %v940_v9 = vrot.slane %v939_v3, 4 }
 0x115   : > { %v913_v11 = vrot.slane %v912_v7, 2  ;;  %v941_v12 = vadd.f32 %v940_v9, %v939_v3 }
 0x117   : > { %v914_v13 = vadd.f32 %v913_v11, %v912_v7  ;;  %v942_v14 = vrot.slane %v941_v12, 2 }
 0x119   : > { %v915_v15 = vrot.slane %v914_v13, 1  ;;  %v943_v16 = vadd.f32 %v942_v14, %v941_v12 }
 0x11b   : > { %v916_v17 = vadd.f32 %v915_v15, %v914_v13  ;;  %v944_v18 = vrot.slane %v943_v16, 1 }
 0x11d   : > { %v945_v19 = vadd.f32 %v944_v18, %v943_v16  ;;  %v946_v20 = vmul.f32 0.015625, %v916_v17 }
 0x11f   : > { %v947_v21 = vmul.f32 0.015625, %v945_v19  ;;  %v948_v23 = vmul.f32 %v946_v20, %v946_v20  ;;  %v951_v24 = vsub.f32 %v1512_v10, %v946_v20  ;;  %v952_v26 = vsub.f32 %v1510_v8, %v946_v20 }
 0x120   : > { %v953_v27 = vsub.f32 %v1526_v25, %v946_v20  ;;  %v954_v28 = vsub.f32 %v1523_v22, %v946_v20  ;;  %v955_v29 = vsub.f32 %v1539_v39, %v946_v20  ;;  %v956_v30 = vsub.f32 %v1534_v36, %v946_v20 }
 0x121   : > { %v949_v31 = vsub.f32 %v947_v21, %v948_v23  ;;  %v957_v32 = vsub.f32 %v893_v55, %v946_v20  ;;  %v958_v33 = vsub.f32 %v894_v54, %v946_v20 }
 0x123   : > { %v950_v34 = vmax.f32 %v949_v31, 0.0 }
 0x125   : > { %v959_v35 = vadd.f32 1e-05, %v950_v34 }
 0x127   : > { %1311 = vrsqrt.f32 %v959_v35 }
 0x131   : > { %v1312_v37 = vpop.eup %1311 }
 0x132   : > { %v961_v38 = vmul.f32 %v1312_v37, %v951_v24  ;;  %v962_v10 = vmul.f32 %v1312_v37, %v952_v26  ;;  %v963_v40 = vmul.f32 %v1312_v37, %v953_v27  ;;  %v964_v8 = vmul.f32 %v1312_v37, %v954_v28 }
 0x133   : > { %v965_v22 = vmul.f32 %v1312_v37, %v955_v29  ;;  %v966_v25 = vmul.f32 %v1312_v37, %v956_v30  ;;  %v967_v39 = vmul.f32 %v1312_v37, %v957_v32  ;;  %v968_v36 = vmul.f32 %v1312_v37, %v958_v33 }
 0x134   : > { %v969_v41 = vmax.f32 %v961_v38, 0.0  ;;  %v970_v42 = vmax.f32 %v962_v10, 0.0  ;;  %v971_v43 = vmax.f32 %v963_v40, 0.0  ;;  %v972_v44 = vmax.f32 %v964_v8, 0.0 }
 0x135   : > { %v973_v45 = vmax.f32 %v965_v22, 0.0  ;;  %v974_v46 = vmax.f32 %v966_v25, 0.0  ;;  %v975_v47 = vmax.f32 %v967_v39, 0.0  ;;  %v976_v48 = vmax.f32 %v968_v36, 0.0 }
 0x136   : > { %977 = vst.msk [vmem:[%s221_s17] sm:$0xff] %vm895_vm10, %v969_v41  ;;  %978 = vst.msk [vmem:[%s221_s17 + $0x8] sm:$0xff] %vm895_vm10, %v970_v42 }
 0x137   : > { %979 = vst.msk [vmem:[%s221_s17 + $0x10] sm:$0xff] %vm895_vm10, %v971_v43  ;;  %980 = vst.msk [vmem:[%s221_s17 + $0x18] sm:$0xff] %vm895_vm10, %v972_v44 }
 0x138   : > { %981 = vst.msk [vmem:[%s221_s17 + $0x20] sm:$0xff] %vm895_vm10, %v973_v45  ;;  %982 = vst.msk [vmem:[%s221_s17 + $0x28] sm:$0xff] %vm895_vm10, %v974_v46 }
 0x139   : > { %983 = vst.msk [vmem:[%s221_s17 + $0x30] sm:$0xff] %vm895_vm10, %v975_v47  ;;  %984 = vst.msk [vmem:[%s221_s17 + $0x38] sm:$0xff] %vm895_vm10, %v976_v48 }
 0x13a PF: > { %s13_s14 = sadd.s32 1, %s1335_s14   ;;  %s1590_s12 = smov %s1331_s13 }
 0x13b   : > { %p10_p5 = scmp.ge.s32.totalorder %s13_s14, 4   ;;  %s1591_s13 = smov %s1593_s15 }
 0x13d   :  { %12 = sbr.rel (!%p10_p5) target bundleno = 2 (0x2), region = 71 }

</bundles_post_ra>
